<compile_context>
chip_gen: v5e
topology: v5e:2x2
jax: 0.10.0
libtpu: 0.0.40
codegen_flags: <defaults>
</compile_context>

<pallas_src>
import functools

import jax
import jax.numpy as jnp
import numpy as np
from jax.experimental import pallas as pl
from jax.experimental.pallas import tpu as pltpu

# ----------------------------- config (small) -------------------------------
B = 2            # batch
L = 8            # word-level sequence length (== max_len_of_batch here)
VOCAB = 100      # token vocab (encoder stub)
POS_VOCAB = 20   # len(vocabs['pos'])
BERT_DIM = 32    # args.bert_dim
TRANS_DIM = 24   # args.bert_trans_dim
SEG_DIM = 8      # use_knowledge=False -> seg_emb_dim = 8 (all zeros)
POS_DIM = 16     # args.pos_dim
D = TRANS_DIM + SEG_DIM + POS_DIM   # biaff_input_size = 48
HID = 32         # args.biaffine_hidden_dim
N_REL = 8        # len(vocabs['rel'])

IN_DIM = BERT_DIM + POS_DIM   # 48: [emb | pos]; all-zero seg block dropped analytically
QDIM = 2 * HID + 1            # 65: ones-augmented [h_head | h_rel | 1] width
NCH = N_REL + 1               # 9 : channel 0 = head scorer, channels 1.. = relations

_HI = jax.lax.Precision.HIGHEST   # host-side preprocessing / pure-JAX reference only


# ----------------------------- fused Pallas kernel ---------------------------
def _fused_parser_kernel(inp_ref, wpb_ref, u_ref, out_ref, *, n, qdim, nch):
    f32 = jnp.float32

    # Stage 1: ONE matmul = folded trans linear + all four deep-biaffine hidden
    # projections + biases + ones-augmentation columns, then ReLU.
    #   inp lanes : [emb(32) | pos(16) | 1]                          (N, 49)
    #   h   lanes : [h1_head(32) | h1_rel(32) | 1 | h2_head(32) | h2_rel(32) | 1]
    h = jnp.maximum(
        jnp.dot(inp_ref[...], wpb_ref[...], preferred_element_type=f32), 0.0)
    h1a = h[:, :qdim]               # (N, 65) ones-augmented "input1" hidden
    h2a = h[:, qdim:2 * qdim]       # (N, 65) ones-augmented "input2" hidden

    # Stage 2: single lane-dense matmul over ALL (head + n_rel) biaffine channels.
    #   t[i, o*qdim + q] = sum_p h1a[i, p] * Ucomb[p, q, o]
    # Row / column / constant ones-augmentation terms and the per-channel output bias
    # are folded into Ucomb host-side, so nothing else has to be added here.
    t = jnp.dot(h1a, u_ref[...], preferred_element_type=f32)        # (N, nch*qdim)

    # Regroup (N, nch*qdim) -> (nch*N, qdim): per-channel lane windows stacked on the
    # sublane axis (the "reshape" spelled with slice+concatenate, which lowers
    # robustly).  Resulting row index is o*N + i (o-major).
    t3 = jnp.concatenate(
        [t[:, o * qdim:(o + 1) * qdim] for o in range(nch)], axis=0)  # (nch*N, qdim)

    # Stage 3: ONE NT matmul produces every head/label score of the whole batch:
    #   S[j, o*N + i] = sum_q h2a[j, q] * t3[o*N + i, q]
    # -> one 144-lane, lane-dense store (no per-batch masked stores, no batch loop).
    out_ref[...] = jax.lax.dot_general(
        h2a, t3, (((1,), (1,)), ((), ())), preferred_element_type=f32)


def fused_parser_scores(inp, wpb, uflat, *, n):
    """One pallas_call, one invocation: everything after the embedding gathers."""
    qdim = uflat.shape[0]
    nch = uflat.shape[1] // qdim
    kernel = functools.partial(_fused_parser_kernel, n=n, qdim=qdim, nch=nch)
    vmem = pl.BlockSpec(memory_space=pltpu.MemorySpace.VMEM)
    return pl.pallas_call(
        kernel,
        out_shape=jax.ShapeDtypeStruct((n, nch * n), jnp.float32),
        in_specs=[vmem, vmem, vmem],
        out_specs=vmem,
    )(inp, wpb, uflat)


# ----------------------------- parameters -----------------------------------
def init_params(key):
    ks = jax.random.split(key, 16)
    s = 0.1
    return {
        # encoder stub (deterministic token embedding table)
        "tok_emb": jax.random.normal(ks[0], (VOCAB, BERT_DIM), jnp.float32),
        # trans_bert_dim_layer
        "w_trans": s * jax.random.normal(ks[1], (BERT_DIM, TRANS_DIM), jnp.float32),
        "b_trans": s * jax.random.normal(ks[2], (1, TRANS_DIM), jnp.float32),
        # pos embedding (padding_idx=0 -> row 0 zeroed)
        "pos_emb": jax.random.normal(ks[3], (POS_VOCAB, POS_DIM), jnp.float32)
                    .at[0].set(0.0),
        # head_biaffine (output size 1)
        "h_w1": s * jax.random.normal(ks[4], (D, HID), jnp.float32),
        "h_b1": s * jax.random.normal(ks[5], (1, HID), jnp.float32),
        "h_w2": s * jax.random.normal(ks[6], (D, HID), jnp.float32),
        "h_b2": s * jax.random.normal(ks[7], (1, HID), jnp.float32),
        "h_U": s * jax.random.normal(ks[8], (HID + 1, HID + 1, 1), jnp.float32),
        "h_Ub": jnp.zeros((1,), jnp.float32),
        # relaton_biaffine (output size n_rel)
        "r_w1": s * jax.random.normal(ks[9], (D, HID), jnp.float32),
        "r_b1": s * jax.random.normal(ks[10], (1, HID), jnp.float32),
        "r_w2": s * jax.random.normal(ks[11], (D, HID), jnp.float32),
        "r_b2": s * jax.random.normal(ks[12], (1, HID), jnp.float32),
        "r_U": s * jax.random.normal(ks[13], (HID + 1, HID + 1, N_REL), jnp.float32),
        "r_Ub": s * jax.random.normal(ks[14], (N_REL,), jnp.float32),
    }


def preprocess_params(p):
    """One-time rearrangement of PyTorch-layout weights into kernel layout."""
    H = HID
    wt, bt = p["w_trans"], p["b_trans"]
    pos_lo = TRANS_DIM + SEG_DIM       # zero seg rows of the hidden weights are dropped

    def fold(w, b):
        # feat @ w + b == emb @ (Wt @ w_x) + pos @ w_p + (bt @ w_x + b)
        w_emb = jnp.matmul(wt, w[:TRANS_DIM], precision=_HI)        # (BERT_DIM, H)
        w_pos = w[pos_lo:]                                          # (POS_DIM, H)
        b_f = jnp.matmul(bt, w[:TRANS_DIM], precision=_HI) + b      # (1, H)
        return jnp.concatenate([w_emb, w_pos], axis=0), b_f

    w1h, b1h = fold(p["h_w1"], p["h_b1"])
    w1r, b1r = fold(p["r_w1"], p["r_b1"])
    w2h, b2h = fold(p["h_w2"], p["h_b2"])
    w2r, b2r = fold(p["r_w2"], p["r_b2"])

    # Packed projection: columns [h1_head | h1_rel | 1 | h2_head | h2_rel | 1];
    # the "1" columns (zero weights, bias 1, relu(1)=1) are the ones-augmentation.
    zcol = jnp.zeros((IN_DIM, 1), jnp.float32)
    one = jnp.ones((1, 1), jnp.float32)
    wp = jnp.concatenate([w1h, w1r, zcol, w2h, w2r, zcol], axis=1)   # (48, 130)
    bp = jnp.concatenate([b1h, b1r, one, b2h, b2r, one], axis=1)     # (1, 130)
    wpb = jnp.concatenate([wp, bp], axis=0)                          # (49, 130)

    # Unified 9-channel biaffine weight Ucomb[p, q, o] with p, q in [0, 2H]:
    #   p/q 0:H   -> head-scorer hidden,  p/q H:2H -> relation-scorer hidden,
    #   p/q == 2H -> the shared ones-augmentation index.
    uh, ur = p["h_U"], p["r_U"]
    u = jnp.zeros((QDIM, QDIM, NCH), jnp.float32)
    # channel 0: head scorer (bias folded into the [2H, 2H] constant)
    u = u.at[:H, :H, 0].set(uh[:H, :H, 0])
    u = u.at[:H, 2 * H, 0].set(uh[:H, H, 0])
    u = u.at[2 * H, :H, 0].set(uh[H, :H, 0])
    u = u.at[2 * H, 2 * H, 0].set(uh[H, H, 0] + p["h_Ub"][0])
    # channels 1..N_REL: relation scorer
    u = u.at[H:2 * H, H:2 * H, 1:].set(ur[:H, :H, :])
    u = u.at[H:2 * H, 2 * H, 1:].set(ur[:H, H, :])
    u = u.at[2 * H, H:2 * H, 1:].set(ur[H, :H, :])
    u = u.at[2 * H, 2 * H, 1:].set(ur[H, H, :] + p["r_Ub"])
    # flatten to (QDIM, NCH*QDIM) with column index = o*QDIM + q (o-major, q-minor)
    uflat = jnp.transpose(u, (0, 2, 1)).reshape(QDIM, NCH * QDIM)    # (65, 585)

    return {"tok_emb": p["tok_emb"], "pos_emb": p["pos_emb"],
            "wpb": wpb, "uflat": uflat}


# ----------------------------- forward pass ---------------------------------
@jax.jit
def parser_model_forward(kp, input_ids, pos_ids, attention_mask):
    # TODO(synk): Parser_encoder (pretrained BERT) not reproduced -> embedding stub;
    # attention_mask is unused and max_len_of_batch is the static sequence length,
    # so padded positions still get (unmasked) scores.
    del attention_mask
    bsz, max_len_of_batch = input_ids.shape
    n = bsz * max_len_of_batch

    emb = kp["tok_emb"][input_ids].reshape(n, BERT_DIM)              # (N, 32)
    pos = kp["pos_emb"][pos_ids[:, :max_len_of_batch]].reshape(n, POS_DIM)
    inp = jnp.concatenate(
        [emb, pos, jnp.ones((n, 1), jnp.float32)], axis=1)           # (N, 49)

    s = fused_parser_scores(inp, kp["wpb"], kp["uflat"], n=n)        # (N, NCH*N)

    # Decode the kernel layout: S[j', o*N + i'] -> per-sentence diagonal blocks.
    nch = kp["uflat"].shape[1] // kp["uflat"].shape[0]
    s = s.reshape(bsz, max_len_of_batch, nch, bsz, max_len_of_batch)  # (bj, j, o, bi, i)
    idx = jnp.arange(bsz)
    diag = s[idx, :, :, idx]                                          # (b, j, o, i)
    head_scores = jnp.transpose(diag[:, :, 0, :], (0, 2, 1))          # (B, i, j)
    label_scores = jnp.transpose(diag[:, :, 1:, :], (0, 3, 1, 2))     # (B, i, j, n_rel)
    return head_scores, label_scores, max_len_of_batch


# ----------------------------- pure-JAX reference ---------------------------
def _biaffine_ref(feat, w1, b1, w2, b2, U, ub):
    h1 = jax.nn.relu(jnp.dot(feat, w1, precision=_HI) + b1)
    h2 = jax.nn.relu(jnp.dot(feat, w2, precision=_HI) + b2)
    ones = jnp.ones(h1.shape[:-1] + (1,), jnp.float32)
    h1a = jnp.concatenate([h1, ones], -1)
    h2a = jnp.concatenate([h2, ones], -1)
    out = jnp.einsum("bip,pqo,bjq->bijo", h1a, U, h2a, precision=_HI)
    return out + ub


def parser_model_ref(params, input_ids, pos_ids):
    emb = params["tok_emb"][input_ids]
    x = jnp.dot(emb, params["w_trans"], precision=_HI) + params["b_trans"]
    pos = params["pos_emb"][pos_ids]
    seg = jnp.zeros((emb.shape[0], emb.shape[1], SEG_DIM), jnp.float32)
    feat = jnp.concatenate([x, seg, pos], axis=2)
    head = _biaffine_ref(feat, params["h_w1"], params["h_b1"], params["h_w2"],
                         params["h_b2"], params["h_U"], params["h_Ub"])[..., 0]
    lbl = _biaffine_ref(feat, params["r_w1"], params["r_b1"], params["r_w2"],
                        params["r_b2"], params["r_U"], params["r_Ub"])
    return head, lbl


# ----------------------------- main ------------------------------------------
if __name__ == "__main__":
    key = jax.random.PRNGKey(0)
    k_param, k_ids, k_pos = jax.random.split(key, 3)
    params = init_params(k_param)
    kparams = preprocess_params(params)     # one-time weight folding / packing

    input_ids = jax.random.randint(k_ids, (B, L), 1, VOCAB, dtype=jnp.int32)
    pos_ids = jax.random.randint(k_pos, (B, L), 1, POS_VOCAB, dtype=jnp.int32)
    attention_mask = jnp.ones((B, L), jnp.int32)

    head_scores, label_scores, max_len = parser_model_forward(
        kparams, input_ids, pos_ids, attention_mask)
    jax.block_until_ready((head_scores, label_scores))

    assert head_scores.shape == (B, L, L)
    assert label_scores.shape == (B, L, L, N_REL)
    assert int(max_len) == L

    # Numerical check against the pure-JAX f32/HIGHEST reference built from the raw
    # PyTorch-style params (validates the weight folding as well).  Tolerance is sized
    # for the kernel's default single-pass bf16 MXU precision.
    ref_head, ref_lbl = parser_model_ref(params, input_ids, pos_ids)
    np.testing.assert_allclose(np.asarray(head_scores), np.asarray(ref_head),
                               rtol=2e-2, atol=2e-2)
    np.testing.assert_allclose(np.asarray(label_scores), np.asarray(ref_lbl),
                               rtol=2e-2, atol=2e-2)

    print("KERNEL_OK")
</pallas_src>

<mosaic_0001>
module attributes {stable_mosaic.version = 11 : i64} {
  func.func @_fused_parser_kernel(%arg0: memref<16x49xf32, #tpu.memory_space<vmem>>, %arg1: memref<49x130xf32, #tpu.memory_space<vmem>>, %arg2: memref<65x585xf32, #tpu.memory_space<vmem>>, %arg3: memref<16x144xf32, #tpu.memory_space<vmem>>) attributes {dimension_semantics = [], scalar_prefetch = 0 : i64, scratch_operands = 0 : i64, tpu.core_type = #tpu.core_type<tc>} {
    %c0 = arith.constant 0 : index
    %c0_0 = arith.constant 0 : index
    %0 = vector.load %arg0[%c0, %c0_0] : memref<16x49xf32, #tpu.memory_space<vmem>>, vector<16x49xf32>
    %c0_1 = arith.constant 0 : index
    %c0_2 = arith.constant 0 : index
    %1 = vector.load %arg1[%c0_1, %c0_2] : memref<49x130xf32, #tpu.memory_space<vmem>>, vector<49x130xf32>
    %cst = arith.constant dense<0.000000e+00> : vector<16x130xf32>
    %2 = tpu.matmul %0, %1, %cst {dimension_numbers = #tpu.dot_dimension_numbers<[1], [0], [0], [1], [0, 0, 1, 1], [], []>} : vector<16x49xf32>, vector<49x130xf32>, vector<16x130xf32> -> vector<16x130xf32>
    %cst_3 = arith.constant 0.000000e+00 : f32
    %3 = vector.broadcast %cst_3 : f32 to vector<16x130xf32>
    %4 = arith.maximumf %2, %3 : vector<16x130xf32>
    %5 = vector.extract_strided_slice %4 {offsets = [0, 0], sizes = [16, 65], strides = [1, 1]} : vector<16x130xf32> to vector<16x65xf32>
    %6 = vector.extract_strided_slice %4 {offsets = [0, 65], sizes = [16, 65], strides = [1, 1]} : vector<16x130xf32> to vector<16x65xf32>
    %c0_4 = arith.constant 0 : index
    %c0_5 = arith.constant 0 : index
    %7 = vector.load %arg2[%c0_4, %c0_5] : memref<65x585xf32, #tpu.memory_space<vmem>>, vector<65x585xf32>
    %cst_6 = arith.constant dense<0.000000e+00> : vector<16x585xf32>
    %8 = tpu.matmul %5, %7, %cst_6 {dimension_numbers = #tpu.dot_dimension_numbers<[1], [0], [0], [1], [0, 0, 1, 1], [], []>} : vector<16x65xf32>, vector<65x585xf32>, vector<16x585xf32> -> vector<16x585xf32>
    %9 = vector.extract_strided_slice %8 {offsets = [0, 0], sizes = [16, 65], strides = [1, 1]} : vector<16x585xf32> to vector<16x65xf32>
    %10 = vector.extract_strided_slice %8 {offsets = [0, 65], sizes = [16, 65], strides = [1, 1]} : vector<16x585xf32> to vector<16x65xf32>
    %11 = vector.extract_strided_slice %8 {offsets = [0, 130], sizes = [16, 65], strides = [1, 1]} : vector<16x585xf32> to vector<16x65xf32>
    %12 = vector.extract_strided_slice %8 {offsets = [0, 195], sizes = [16, 65], strides = [1, 1]} : vector<16x585xf32> to vector<16x65xf32>
    %13 = vector.extract_strided_slice %8 {offsets = [0, 260], sizes = [16, 65], strides = [1, 1]} : vector<16x585xf32> to vector<16x65xf32>
    %14 = vector.extract_strided_slice %8 {offsets = [0, 325], sizes = [16, 65], strides = [1, 1]} : vector<16x585xf32> to vector<16x65xf32>
    %15 = vector.extract_strided_slice %8 {offsets = [0, 390], sizes = [16, 65], strides = [1, 1]} : vector<16x585xf32> to vector<16x65xf32>
    %16 = vector.extract_strided_slice %8 {offsets = [0, 455], sizes = [16, 65], strides = [1, 1]} : vector<16x585xf32> to vector<16x65xf32>
    %17 = vector.extract_strided_slice %8 {offsets = [0, 520], sizes = [16, 65], strides = [1, 1]} : vector<16x585xf32> to vector<16x65xf32>
    %18 = tpu.concatenate %9, %10, %11, %12, %13, %14, %15, %16, %17 in 0 : vector<16x65xf32>, vector<16x65xf32>, vector<16x65xf32>, vector<16x65xf32>, vector<16x65xf32>, vector<16x65xf32>, vector<16x65xf32>, vector<16x65xf32>, vector<16x65xf32> -> vector<144x65xf32>
    %cst_7 = arith.constant dense<0.000000e+00> : vector<16x144xf32>
    %19 = tpu.matmul %6, %18, %cst_7 {dimension_numbers = #tpu.dot_dimension_numbers<[1], [1], [0], [0], [0, 0, 1, 0], [], []>} : vector<16x65xf32>, vector<144x65xf32>, vector<16x144xf32> -> vector<16x144xf32>
    %c0_8 = arith.constant 0 : index
    %c0_9 = arith.constant 0 : index
    %20 = vector.load %arg3[%c0_8, %c0_9] : memref<16x144xf32, #tpu.memory_space<vmem>>, vector<16x144xf32>
    tpu.vector_store %arg3[%c0_8, %c0_9], %19 {strides = array<i32>} : memref<16x144xf32, #tpu.memory_space<vmem>>, vector<16x144xf32>,
    return
  }
}

</mosaic_0001>

<bundles_post_ra>
// kernel: parser_model_forward.1
= control target key start
LH: loop header
LB: loop body
LE: loop exit
PB: predicated region body
PF: predicated region fallthrough
CT: control target
= control target key end

     0   :  { %8 = vsyncpa [#allocation3], 0  ;;  %s550_s15 = smov [#allocation2]   ;;  %s551_s17 = smov 640   ;;  %s699_s0 = inlined_call_operand.vmem [shape: f32[16,49], index: 0, kind: input, shape index: {}]   ;;  %s700_s1 = inlined_call_operand.vmem [shape: f32[49,130], index: 1, kind: input, shape index: {}]   ;;  %s701_s2 = inlined_call_operand.hbm [shape: f32[65,585], index: 2, kind: input, shape index: {}]   ;;  %s702_s3 = inlined_call_operand.vmem [shape: f32[16,144], index: 3, kind: output, shape index: {}]  }
   0x1   :  { %s17_s14 = sshll.u32 %s701_s2, 4  ;;  %s19_s16 = sshll.u32 %s550_s15, 4  ;;  %s18_s14 = int_to_ptr.hbm [resolvable:$true] %s17_s14  ;;  %s20_s16 = int_to_ptr.vmem [resolvable:$true] %s19_s16 }
   0x2   :  { %s552_s18 = smov 40  }
   0x3   :  { %25 = dma.hbm_to_vmem [thread:$0]  %s18_s14, 5760, %s20_s16, [#allocation3], %s551_s17, %s551_s17, %s552_s18  }
   0x4   :  { %548 = dma.done.wait [#allocation3], 5760  }
   0x5   :  { %549 = vsyncadd [#allocation3], 4294961536  ;;  %vm53_vm0 = vcmask 1040384   ;;  %v44_v0 = vld [vmem:[%s700_s1 + $0x60] sm:$0x1]  ;;  %v42_v1 = vld [vmem:[%s700_s1 + $0x50] sm:$0xff] }
   0x6   :  { %470 = vmatpush.msk.msra.mxu0 %vm53_vm0, %v44_v0  ;;  %v40_v2 = vld [vmem:[%s700_s1 + $0x40] sm:$0xff]  ;;  %v45_v3 = vld [vmem:[%s700_s1 + $0x68] sm:$0x1]  ;;  %v43_v4 = vld [vmem:[%s700_s1 + $0x58] sm:$0xff]  ;;  %vm46_vm1 = vcmask 400384   ;;  %vm155_vm2 = vcmask 531456  }
   0x7   :  { %v38_v5 = vld [vmem:[%s700_s1 + $0x30] sm:$0xff]  ;;  %473 = vmatpush.msk.msra.mxu1 %vm53_vm0, %v45_v3  ;;  %v41_v6 = vld [vmem:[%s700_s1 + $0x48] sm:$0xff]  ;;  %v150_v7 = vld [vmem:[#allocation2 + $0x140] sm:$0x1]  ;;  %s554_s22 = smov 122   ;;  %s555_s2 = smov 59  }
   0x8   :  { %70 = vmatpush.msra.mxu0 %v42_v1  ;;  %v36_v8 = vld [vmem:[%s700_s1 + $0x20] sm:$0xff]  ;;  %476 = vmatpush.msk.msra.mxu2 %vm53_vm0, %v150_v7  ;;  %v145_v9 = vld [vmem:[#allocation2 + $0x118] sm:$0xff]  ;;  %v140_v11 = vld [vmem:[#allocation2 + $0xf0] sm:$0xff]  ;;  %s556_s23 = smov 124   ;;  %s557_s24 = smov 61   ;;  %vm355_vm3 = vcmask 465920  }
   0x9   :  { %93 = vmatpush.msra.mxu1 %v43_v4  ;;  %v39_v10 = vld [vmem:[%s700_s1 + $0x38] sm:$0xff]  ;;  %v34_v12 = vld [vmem:[%s700_s1 + $0x10] sm:$0xff]  ;;  %v37_v13 = vld [vmem:[%s700_s1 + $0x28] sm:$0xff]  ;;  %s558_s25 = smov 126   ;;  %s559_s26 = smov 63   ;;  %vm338_vm4 = vcmask 482304  }
   0xa   :  { %71 = vmatpush.msra.mxu0 %v40_v2  ;;  %185 = vmatpush.msra.mxu2 %v145_v9  ;;  %v135_v14 = vld [vmem:[#allocation2 + $0xc8] sm:$0xff]  ;;  %v32_v15 = vld [vmem:[%s700_s1] sm:$0xff]  ;;  %v35_v17 = vld [vmem:[%s700_s1 + $0x18] sm:$0xff]  ;;  %s560_s27 = smov 120   ;;  %vm321_vm5 = vcmask 498688   ;;  %vm304_vm6 = vcmask 515072  }
   0xb   :  { %94 = vmatpush.msra.mxu1 %v41_v6  ;;  %v30_v16 = vld [vmem:[%s699_s0] sm:$0xff]  ;;  %v152_v18 = vld [vmem:[#allocation2 + $0x150] sm:$0x1]  ;;  %v33_v20 = vld [vmem:[%s700_s1 + $0x8] sm:$0xff]  ;;  %vm461_vm7 = vcmask 130048  }
   0xc   :  { %72 = vmatpush.msra.mxu0 %v38_v5  ;;  %186 = vmatpush.msra.mxu2 %v140_v11  ;;  %v130_v19 = vld [vmem:[#allocation2 + $0xa0] sm:$0xff]  ;;  %v151_v21 = vld [vmem:[#allocation2 + $0x148] sm:$0x1]  ;;  %v125_v23 = vld [vmem:[#allocation2 + $0x78] sm:$0xff] }
   0xd   :  { %95 = vmatpush.msra.mxu1 %v39_v10  ;;  %v147_v22 = vld [vmem:[#allocation2 + $0x128] sm:$0xff]  ;;  %v146_v24 = vld [vmem:[#allocation2 + $0x120] sm:$0xff]  ;;  %v120_v26 = vld [vmem:[#allocation2 + $0x50] sm:$0xff] }
   0xe   :  { %73 = vmatpush.msra.mxu0 %v36_v8  ;;  %187 = vmatpush.msra.mxu2 %v135_v14  ;;  %v142_v25 = vld [vmem:[#allocation2 + $0x100] sm:$0xff]  ;;  %v141_v27 = vld [vmem:[#allocation2 + $0xf8] sm:$0xff]  ;;  %v31_v29 = vld [vmem:[%s699_s0 + $0x8] sm:$0xff]  ;;  %s553_s0 = smov 57  }
   0xf   :  { %96 = vmatpush.msra.mxu1 %v37_v13  ;;  %v137_v28 = vld [vmem:[#allocation2 + $0xd8] sm:$0xff]  ;;  %v115_v30 = vld [vmem:[#allocation2 + $0x28] sm:$0xff]  ;;  %v136_v31 = vld [vmem:[#allocation2 + $0xd0] sm:$0xff] }
  0x10   :  { %74 = vmatpush.msra.mxu0 %v34_v12  ;;  %188 = vmatpush.msra.mxu2 %v130_v19  ;;  %v132_v32 = vld [vmem:[#allocation2 + $0xb0] sm:$0xff]  ;;  %v131_v33 = vld [vmem:[#allocation2 + $0xa8] sm:$0xff]  ;;  %v126_v35 = vld [vmem:[#allocation2 + $0x80] sm:$0xff] }
  0x11   :  { %97 = vmatpush.msra.mxu1 %v35_v17  ;;  %v127_v34 = vld [vmem:[#allocation2 + $0x88] sm:$0xff]  ;;  %v122_v36 = vld [vmem:[#allocation2 + $0x60] sm:$0xff]  ;;  %v121_v37 = vld [vmem:[#allocation2 + $0x58] sm:$0xff] }
  0x12   :  { %75 = vmatpush.msra.mxu0 %v32_v15  ;;  %189 = vmatpush.msra.mxu2 %v125_v23  ;;  %v116_v38 = vld [vmem:[#allocation2 + $0x30] sm:$0xff]  ;;  %v117_v39 = vld [vmem:[#allocation2 + $0x38] sm:$0xff]  ;;  %v110_v40 = vld [vmem:[#allocation2] sm:$0xff] }
  0x13   :  { %471 = vmatmul.msk.f32.vlgmr.msra.gmra.mxu0 %vm46_vm1, %v30_v16  ;;  %98 = vmatpush.msra.mxu1 %v33_v20  ;;  %v111_v41 = vld [vmem:[#allocation2 + $0x8] sm:$0xff]  ;;  %v112_v42 = vld [vmem:[#allocation2 + $0x10] sm:$0xff]  ;;  %v153_v43 = vld [vmem:[#allocation2 + $0x158] sm:$0x1] }
  0x14   :  { %482 = vmatpush.msk.msrb.mxu0 %vm53_vm0, %v152_v18  ;;  %474 = vmatmul.msk.f32.vlgmr.msra.gmra.mxu1 %vm46_vm1, %v30_v16  ;;  %v154_v44 = vld [vmem:[#allocation2 + $0x160] sm:$0x1]  ;;  %v148_v45 = vld [vmem:[#allocation2 + $0x130] sm:$0xff]  ;;  %v149_v46 = vld [vmem:[#allocation2 + $0x138] sm:$0xff] }
  0x15   :  { %479 = vmatpush.msk.msrb.mxu1 %vm53_vm0, %v151_v21  ;;  %190 = vmatpush.msra.mxu2 %v120_v26  ;;  %v143_v47 = vld [vmem:[#allocation2 + $0x108] sm:$0xff]  ;;  %v144_v48 = vld [vmem:[#allocation2 + $0x110] sm:$0xff]  ;;  %v138_v49 = vld [vmem:[#allocation2 + $0xe0] sm:$0xff] }
  0x16   :  { %231 = vmatpush.msrb.mxu0 %v147_v22  ;;  %v139_v50 = vld [vmem:[#allocation2 + $0xe8] sm:$0xff]  ;;  %v133_v51 = vld [vmem:[#allocation2 + $0xb8] sm:$0xff]  ;;  %v134_v52 = vld [vmem:[#allocation2 + $0xc0] sm:$0xff] }
  0x17   :  { %208 = vmatpush.msrb.mxu1 %v146_v24  ;;  %191 = vmatpush.msra.mxu2 %v115_v30  ;;  %v128_v53 = vld [vmem:[#allocation2 + $0x90] sm:$0xff]  ;;  %v129_v54 = vld [vmem:[#allocation2 + $0x98] sm:$0xff]  ;;  %v123_v55 = vld [vmem:[#allocation2 + $0x68] sm:$0xff] }
  0x18   :  { %232 = vmatpush.msrb.mxu0 %v142_v25  ;;  %v124_v56 = vld [vmem:[#allocation2 + $0x70] sm:$0xff]  ;;  %v118_v57 = vld [vmem:[#allocation2 + $0x40] sm:$0xff]  ;;  %v119_v58 = vld [vmem:[#allocation2 + $0x48] sm:$0xff] }
  0x19   :  { %209 = vmatpush.msrb.mxu1 %v141_v27  ;;  %192 = vmatpush.msra.mxu2 %v110_v40  ;;  %v113_v59 = vld [vmem:[#allocation2 + $0x18] sm:$0xff]  ;;  %v114_v60 = vld [vmem:[#allocation2 + $0x20] sm:$0xff] }
  0x1a   :  { %233 = vmatpush.msrb.mxu0 %v137_v28 }
  0x1b   :  { %472 = vmatmul.msk.f32.gmra.mxu0 %vm46_vm1, %v31_v29  ;;  %210 = vmatpush.msrb.mxu1 %v136_v31 }
  0x1c   :  { %234 = vmatpush.msrb.mxu0 %v132_v32  ;;  %475 = vmatmul.msk.f32.gmra.mxu1 %vm46_vm1, %v31_v29 }
  0x1d   :  { %211 = vmatpush.msrb.mxu1 %v131_v33  ;;  %488 = vmatpush.msk.msrb.mxu2 %vm53_vm0, %v154_v44 }
  0x1e   :  { %235 = vmatpush.msrb.mxu0 %v127_v34 }
  0x1f   :  { %212 = vmatpush.msrb.mxu1 %v126_v35  ;;  %277 = vmatpush.msrb.mxu2 %v149_v46 }
  0x20   :  { %236 = vmatpush.msrb.mxu0 %v122_v36 }
  0x21   :  { %213 = vmatpush.msrb.mxu1 %v121_v37  ;;  %278 = vmatpush.msrb.mxu2 %v144_v48 }
  0x22   :  { %237 = vmatpush.msrb.mxu0 %v117_v39 }
  0x23   :  { %214 = vmatpush.msrb.mxu1 %v116_v38  ;;  %279 = vmatpush.msrb.mxu2 %v139_v50 }
  0x24   :  { %238 = vmatpush.msrb.mxu0 %v112_v42 }
  0x25   :  { %215 = vmatpush.msrb.mxu1 %v111_v41  ;;  %280 = vmatpush.msrb.mxu2 %v134_v52 }
  0x27   :  { %485 = vmatpush.msk.msra.mxu1 %vm53_vm0, %v153_v43  ;;  %281 = vmatpush.msrb.mxu2 %v129_v54 }
  0x29   :  { %254 = vmatpush.msra.mxu1 %v148_v45  ;;  %282 = vmatpush.msrb.mxu2 %v124_v56 }
  0x2b   :  { %255 = vmatpush.msra.mxu1 %v143_v47  ;;  %283 = vmatpush.msrb.mxu2 %v119_v58 }
  0x2d   :  { %256 = vmatpush.msra.mxu1 %v138_v49  ;;  %284 = vmatpush.msrb.mxu2 %v114_v60 }
  0x2f   :  { %257 = vmatpush.msra.mxu1 %v133_v51 }
  0x31   :  { %258 = vmatpush.msra.mxu1 %v128_v53 }
  0x33   :  { %259 = vmatpush.msra.mxu1 %v123_v55 }
  0x35   :  { %260 = vmatpush.msra.mxu1 %v118_v57 }
  0x37   :  { %261 = vmatpush.msra.mxu1 %v113_v59 }
  0x90   :  { %v77_v61 = vpop.f32.mrf.mxu0 }
  0x91   :  { %v106_v62 = vmax.f32 %v77_v61, 0.0  ;;  %v100_v1 = vpop.f32.mrf.mxu1 }
  0x92   :  { %v107_v13 = vmax.f32 %v100_v1, 0.0 }
  0x93   :  { %477 = vmatmul.msk.f32.vlgmr.msra.gmra.mxu2 %vm155_vm2, %v106_v62  ;;  %480 = vmatmul.msk.f32.vlgmr.msrb.gmra.mxu1 %vm155_vm2, %v106_v62 }
  0x94   :  { %483 = vmatmul.msk.f32.vlgmr.msrb.gmra.mxu0 %vm155_vm2, %v106_v62 }
  0x98   :  { %v80_v63 = vpop.f32.mrf.mxu0 }
  0x99   :  { %v108_v0 = vmax.f32 %v80_v63, 0.0  ;;  %v103_v2 = vpop.f32.mrf.mxu1 }
  0x9a   :  { %v109_v14 = vmax.f32 %v103_v2, 0.0 }
  0x9b   :  { %478 = vmatmul.msk.f32.gmra.mxu2 %vm155_vm2, %v108_v0  ;;  %481 = vmatmul.msk.f32.gmra.mxu1 %vm155_vm2, %v108_v0 }
  0x9c   :  { %484 = vmatmul.msk.f32.gmra.mxu0 %vm155_vm2, %v108_v0 }
  0xa3   :  { %486 = vmatmul.msk.f32.vlgmr.msra.gmra.mxu1 %vm155_vm2, %v106_v62  ;;  %489 = vmatmul.msk.f32.vlgmr.msrb.gmra.mxu2 %vm155_vm2, %v106_v62 }
  0xab   :  { %487 = vmatmul.msk.f32.gmra.mxu1 %vm155_vm2, %v108_v0  ;;  %490 = vmatmul.msk.f32.gmra.mxu2 %vm155_vm2, %v108_v0 }
 0x110   :  { %v217_v3 = vpop.f32.mrf.mxu1 }
 0x111   :  { %v240_v10 = vpop.f32.mrf.mxu0 }
 0x116   :  { %v653_v4 = vpop.f32.mrf.mxu2 }
 0x118   :  { %v220_v5 = vpop.f32.mrf.mxu1 }
 0x119   :  { %v243_v12 = vpop.f32.mrf.mxu0 }
 0x11e   :  { %v655_v6 = vpop.f32.mrf.mxu2 }
 0x120   :  { %v263_v7 = vpop.f32.mrf.mxu1 }
 0x121   :  { %347 = vrot.lane.b32.xlu1 %v263_v7, %s553_s0 }
 0x126   :  { %v286_v8 = vpop.f32.mrf.mxu2 }
 0x128   :  { %v266_v9 = vpop.f32.mrf.mxu1 }
 0x129   :  { %343 = vrot.lane.b32.xlu2 %v266_v9, %s554_s22  ;;  %351 = vrot.lane.b32.xlu0 %v266_v9, %s553_s0 }
 0x12a   :  { %349 = vrot.lane.b32.xlu1 %v286_v8, %s553_s0 }
 0x12e   :  { %v289_v11 = vpop.f32.mrf.mxu2 }
 0x131   :  { %341 = vrot.lane.b32.xlu2 %v263_v7, %s554_s22  ;;  %353 = vrot.lane.b32.xlu0 %v289_v11, %s553_s0 }
 0x132   :  { %336 = vrot.lane.b32.xlu1 %v266_v9, %s555_s2 }
 0x139   :  { %330 = vrot.lane.b32.xlu2 %v240_v10, %s555_s2  ;;  %334 = vrot.lane.b32.xlu0 %v243_v12, %s555_s2 }
 0x13a   :  { %326 = vrot.lane.b32.xlu1 %v243_v12, %s556_s23 }
 0x141   :  { %324 = vrot.lane.b32.xlu2 %v240_v10, %s556_s23  ;;  %332 = vrot.lane.b32.xlu0 %v263_v7, %s555_s2 }
 0x142   :  { %319 = vrot.lane.b32.xlu1 %v243_v12, %s557_s24 }
 0x149   :  { %313 = vrot.lane.b32.xlu2 %v217_v3, %s557_s24  ;;  %317 = vrot.lane.b32.xlu0 %v220_v5, %s557_s24 }
 0x14a   :  { %309 = vrot.lane.b32.xlu1 %v220_v5, %s558_s25 }
 0x151   :  { %307 = vrot.lane.b32.xlu2 %v217_v3, %s558_s25  ;;  %315 = vrot.lane.b32.xlu0 %v240_v10, %s557_s24 }
 0x152   :  { %302 = vrot.lane.b32.xlu1 %v220_v5, %s559_s26 }
 0x159   :  { %296 = vrot.lane.b32.xlu2 %v653_v4, %s559_s26  ;;  %300 = vrot.lane.b32.xlu0 %v655_v6, %s559_s26 }
 0x15a   :  { %360 = vrot.lane.b32.xlu1 %v289_v11, %s560_s27 }
 0x161   :  { %364 = vrot.lane.b32.xlu2 %v106_v62, %s559_s26  ;;  %298 = vrot.lane.b32.xlu0 %v217_v3, %s559_s26 }
 0x162   :  { %358 = vrot.lane.b32.xlu1 %v286_v8, %s560_s27 }
 0x169   :  { %368 = vrot.lane.b32.xlu2 %v108_v0, %s559_s26  ;;  %366 = vrot.lane.b32.xlu0 %v107_v13, %s559_s26 }
 0x171   :  { %370 = vrot.lane.b32.xlu0 %v109_v14, %s559_s26 }
 0x183   :  { %v344_v15 = vpop.permute.xlu2 %343 }
 0x18b   :  { %v342_v19 = vpop.permute.xlu2 %341 }
 0x193   :  { %v348_v16 = vpop.permute.xlu1 %347  ;;  %v331_v23 = vpop.permute.xlu2 %330 }
 0x19b   :  { %v352_v17 = vpop.permute.xlu0 %351  ;;  %v325_v27 = vpop.permute.xlu2 %324 }
 0x19c   :  { %v350_v18 = vpop.permute.xlu1 %349 }
 0x19d   :  { %v356_v24 = vsel %vm355_vm3, %v348_v16, %v350_v18 }
 0x1a3   :  { %v354_v20 = vpop.permute.xlu0 %353  ;;  %v314_v32 = vpop.permute.xlu2 %313 }
 0x1a4   :  { %v337_v21 = vpop.permute.xlu1 %336  ;;  %v357_v22 = vsel %vm355_vm3, %v352_v17, %v354_v20 }
 0x1a5   :  { %491 = vmatpush.xpose.msk.msra.mxu3 %vm155_vm2, %v357_v22 }
 0x1a9   :  { %492 = vmatpush.xpose.msk.msra.mxu3 %vm155_vm2, %v356_v24 }
 0x1ab   :  { %v335_v25 = vpop.permute.xlu0 %334  ;;  %v308_v38 = vpop.permute.xlu2 %307 }
 0x1ac   :  { %v327_v26 = vpop.permute.xlu1 %326  ;;  %v340_v30 = vsel %vm338_vm4, %v335_v25, %v337_v21 }
 0x1ad   :  { %493 = vmatpush.xpose.msk.msra.mxu3 %vm155_vm2, %v344_v15 }
 0x1b1   :  { %494 = vmatpush.xpose.msk.msra.mxu3 %vm155_vm2, %v342_v19 }
 0x1b3   :  { %v333_v28 = vpop.permute.xlu0 %332  ;;  %v297_v42 = vpop.permute.xlu2 %296 }
 0x1b4   :  { %v320_v29 = vpop.permute.xlu1 %319  ;;  %v339_v31 = vsel %vm338_vm4, %v331_v23, %v333_v28 }
 0x1b5   :  { %495 = vmatpush.xpose.msk.msra.mxu3 %vm155_vm2, %v340_v30 }
 0x1b9   :  { %496 = vmatpush.xpose.msk.msra.mxu3 %vm155_vm2, %v339_v31 }
 0x1bb   :  { %v318_v33 = vpop.permute.xlu0 %317  ;;  %v365_v47 = vpop.permute.xlu2 %364 }
 0x1bc   :  { %v310_v34 = vpop.permute.xlu1 %309  ;;  %v323_v37 = vsel %vm321_vm5, %v318_v33, %v320_v29 }
 0x1bd   :  { %497 = vmatpush.xpose.msk.msra.mxu3 %vm155_vm2, %v327_v26 }
 0x1c1   :  { %498 = vmatpush.xpose.msk.msra.mxu3 %vm155_vm2, %v325_v27 }
 0x1c3   :  { %v316_v35 = vpop.permute.xlu0 %315  ;;  %v369_v50 = vpop.permute.xlu2 %368 }
 0x1c4   :  { %v303_v36 = vpop.permute.xlu1 %302  ;;  %v322_v39 = vsel %vm321_vm5, %v314_v32, %v316_v35 }
 0x1c5   :  { %499 = vmatpush.xpose.msk.msra.mxu3 %vm155_vm2, %v323_v37 }
 0x1c9   :  { %500 = vmatpush.xpose.msk.msra.mxu3 %vm155_vm2, %v322_v39 }
 0x1cb   :  { %v301_v40 = vpop.permute.xlu0 %300 }
 0x1cc   :  { %v361_v41 = vpop.permute.xlu1 %360  ;;  %v306_v45 = vsel %vm304_vm6, %v301_v40, %v303_v36 }
 0x1cd   :  { %509 = vmatpush.xpose.msk.msra.mxu0 %vm155_vm2, %v361_v41  ;;  %501 = vmatpush.xpose.msk.msra.mxu3 %vm155_vm2, %v310_v34 }
 0x1d1   :  { %502 = vmatpush.xpose.msk.msra.mxu3 %vm155_vm2, %v308_v38 }
 0x1d3   :  { %v299_v43 = vpop.permute.xlu0 %298 }
 0x1d4   :  { %v359_v44 = vpop.permute.xlu1 %358  ;;  %v305_v46 = vsel %vm304_vm6, %v297_v42, %v299_v43 }
 0x1d5   :  { %510 = vmatpush.xpose.msk.msra.mxu0 %vm155_vm2, %v359_v44  ;;  %503 = vmatpush.xpose.msk.msra.mxu3 %vm155_vm2, %v306_v45 }
 0x1d9   :  { %504 = vmatpush.xpose.msk.msra.mxu3 %vm155_vm2, %v305_v46 }
 0x1db   :  { %v367_v48 = vpop.permute.xlu0 %366 }
 0x1dc   :  { %v372_v49 = vsel %vm304_vm6, %v365_v47, %v367_v48 }
 0x1dd   :  { %505 = vmatpush.xpose.msk.msra.mxu3 %vm155_vm2, %v655_v6  ;;  %511 = vmatmul.msk.f32.vlgmr.msra.gmra.mxu0 %vm155_vm2, %v372_v49 }
 0x1e1   :  { %506 = vmatpush.xpose.msk.msra.mxu3 %vm155_vm2, %v653_v4 }
 0x1e3   :  { %v371_v51 = vpop.permute.xlu0 %370 }
 0x1e4   :  { %507 = vmatmul.msk.f32.vlgmr.msra.gmra.mxu3 %vm155_vm2, %v372_v49  ;;  %v373_v52 = vsel %vm304_vm6, %v369_v50, %v371_v51 }
 0x1e5   :  { %512 = vmatmul.msk.f32.gmra.mxu0 %vm155_vm2, %v373_v52 }
 0x1ec   :  { %508 = vmatmul.msk.f32.gmra.mxu3 %vm155_vm2, %v373_v52 }
 0x25a   :  { %v454_v53 = vpop.f32.mrf.mxu0 }
 0x25b   :  { %462 = vst.msk [vmem:[%s702_s3 + $0x8] sm:$0xff] %vm461_vm7, %v454_v53 }
 0x262   :  { %v457_v54 = vpop.f32.mrf.mxu0 }
 0x263   :  { %464 = vst.msk [vmem:[%s702_s3 + $0x18] sm:$0xff] %vm461_vm7, %v457_v54 }
 0x267   :  { %v431_v55 = vpop.f32.mrf.mxu3 }
 0x268   :  { %460 = vst [vmem:[%s702_s3] sm:$0xff] %v431_v55 }
 0x26f   :  { %v434_v56 = vpop.f32.mrf.mxu3 }
 0x270   :  { %463 = vst [vmem:[%s702_s3 + $0x10] sm:$0xff] %v434_v56 }
 0x271   :  { %469 = vsyncpa [#allocation3], 1 }

</bundles_post_ra>
